<compile_context>
chip_gen: v6e
topology: v6e:2x2x1
jax: 0.10.0
libtpu: 0.0.40
codegen_flags: <defaults>
</compile_context>

<pallas_src>
import jax
import jax.numpy as jnp
import numpy as np
from jax import lax
from jax.experimental import pallas as pl
from jax.experimental.pallas import tpu as pltpu


# ---------------------------------------------------------------------------
# Fused Pallas kernel: maxpool 2x2 -> conv3x3(reflect)+LeakyReLU -> conv3x3+LeakyReLU
# ---------------------------------------------------------------------------
def _down_unit_kernel(x_ref, w1_ref, w2_ref, o_ref):
    # x_ref : (Cin, H, W)          -- NCHW block, leading batch dim squeezed
    # w1_ref: (Cmid, 9*Cin)        -- tap-major (di, dj, ci) flattened weights
    # w2_ref: (Cout, 9*Cmid)
    # o_ref : (Cout, H2*W2)        -- lane-dense output block (pixels in lanes)
    Cin, H, W = x_ref.shape
    H2, W2 = H // 2, W // 2
    Hp, Wp = H2 + 2, W2 + 2          # reflect-padded pooled spatial dims
    Cout = o_ref.shape[0]
    dt = x_ref.dtype

    # ---- constant 0/1 selection matrices (built from iota, exact) ----------
    # Column b of a W-reflect-padded pooled row reads pooled column src(b);
    # a_even/a_odd pick the even / odd source column of the un-pooled row.
    wi = lax.broadcasted_iota(jnp.int32, (W, Wp), 0)
    bi = lax.broadcasted_iota(jnp.int32, (W, Wp), 1)
    src = jnp.where(bi == 0, 1, jnp.where(bi == Wp - 1, W2 - 2, bi - 1))
    a_even = (wi == 2 * src).astype(dt)
    a_odd = (wi == 2 * src + 1).astype(dt)

    # ---- MaxPool2d(kernel=2, stride=2), fused with W reflect-padding -------
    # H-pair max per pooled row (static row reads), then even/odd column max
    # + reflect pad via two tiny exact selection matmuls on the MXU.
    hrows = [jnp.maximum(x_ref[:, 2 * h, :], x_ref[:, 2 * h + 1, :])
             for h in range(H2)]                      # each (Cin, W)
    big = jnp.concatenate(hrows, axis=0)              # (H2*Cin, W)
    pp_big = jnp.maximum(
        jnp.dot(big, a_even, preferred_element_type=jnp.float32),
        jnp.dot(big, a_odd, preferred_element_type=jnp.float32)).astype(dt)
    # pp_big: (H2*Cin, Wp) -- pooled rows, already reflect-padded along W
    prows = [pp_big[h * Cin:(h + 1) * Cin, :] for h in range(H2)]   # (Cin, Wp)

    def rh(a):  # reflect row index (PyTorch 'reflect': edge excluded)
        return 1 if a == 0 else (H2 - 2 if a == Hp - 1 else a - 1)

    def conv3x3_lrelu(padded_rows, w2d):
        # padded_rows: Hp arrays of shape (C, Wp) -- reflect-padded input rows.
        # One folded MXU matmul: (Co, 9C) @ (9C, H2*Wp).  Pixels stay in lanes;
        # every tap is a contiguous lane slice of the flat padded map.
        C = padded_rows[0].shape[0]
        flat = jnp.concatenate(
            padded_rows + [jnp.zeros((C, 2), padded_rows[0].dtype)], axis=1)
        taps = [flat[:, di * Wp + dj: di * Wp + dj + H2 * Wp]
                for di in range(3) for dj in range(3)]
        patches = jnp.concatenate(taps, axis=0)       # (9C, H2*Wp)
        z = jnp.dot(w2d, patches, preferred_element_type=jnp.float32)
        return jnp.maximum(z, 0.01 * z)               # LeakyReLU(0.01), f32

    # ---- conv1 + LeakyReLU (f32 accumulation, stays f32 into conv2) --------
    z1 = conv3x3_lrelu([prows[rh(a)] for a in range(Hp)], w1_ref[...])

    # ---- conv2 + LeakyReLU --------------------------------------------------
    rows1 = [z1[:, i * Wp: i * Wp + W2] for i in range(H2)]   # valid (Cmid, W2)

    def wpad(r):  # reflect pad along W
        return jnp.concatenate([r[:, 1:2], r, r[:, W2 - 2:W2 - 1]], axis=1)

    prows1 = [wpad(r) for r in rows1]
    z2 = conv3x3_lrelu([prows1[rh(a)] for a in range(Hp)], w2_ref[...])

    # TODO(synk): nn.Dropout2d training-mode channel masking not implemented
    # (eval-mode identity semantics only).
    out = jnp.concatenate([z2[:, i * Wp: i * Wp + W2] for i in range(H2)],
                          axis=1)                     # (Cout, H2*W2)
    o_ref[...] = out.astype(o_ref.dtype)


# ---------------------------------------------------------------------------
# Wrapper: weight flattening + single pallas_call (no input/output transposes)
# ---------------------------------------------------------------------------
def downsampling_unit_forward(x_nchw, w1_oihw, w2_oihw):
    N, Cin, H, W = x_nchw.shape
    assert H % 2 == 0 and W % 2 == 0
    H2, W2 = H // 2, W // 2
    assert H2 >= 2 and W2 >= 2, "reflect padding needs pooled spatial dims >= 2"
    Cmid = w1_oihw.shape[0]
    Cout = w2_oihw.shape[0]

    # PyTorch OIHW -> (Co, 9*Ci), tap-major (di, dj, ci) -- matches the in-kernel
    # patch-row ordering; one small 2-D lane-padded weight block per conv.
    w1_2d = jnp.transpose(w1_oihw, (0, 2, 3, 1)).reshape(Cmid, 9 * Cin)
    w2_2d = jnp.transpose(w2_oihw, (0, 2, 3, 1)).reshape(Cout, 9 * Cmid)

    y = pl.pallas_call(
        _down_unit_kernel,
        out_shape=jax.ShapeDtypeStruct((N, Cout, H2 * W2), x_nchw.dtype),
        grid=(N,),
        in_specs=[
            pl.BlockSpec((None, Cin, H, W), lambda n: (n, 0, 0, 0)),
            pl.BlockSpec((Cmid, 9 * Cin), lambda n: (0, 0)),
            pl.BlockSpec((Cout, 9 * Cmid), lambda n: (0, 0)),
        ],
        out_specs=pl.BlockSpec((None, Cout, H2 * W2), lambda n: (n, 0, 0)),
        compiler_params=pltpu.CompilerParams(
            dimension_semantics=("parallel",),
            vmem_limit_bytes=32 * 1024 * 1024),
    )(x_nchw, w1_2d, w2_2d)

    # Free (contiguous) reshape back to NCHW spatial form.
    return y.reshape(N, Cout, H2, W2)


# ---------------------------------------------------------------------------
# Pure-JAX reference (sanity check of semantics, eval mode)
# ---------------------------------------------------------------------------
def reference_forward(x_nchw, w1, w2):
    x = jnp.transpose(x_nchw, (0, 2, 3, 1))
    x = lax.reduce_window(x, -jnp.inf, lax.max,
                          (1, 2, 2, 1), (1, 2, 2, 1), 'VALID')

    def conv(x, w):
        xp = jnp.pad(x, ((0, 0), (1, 1), (1, 1), (0, 0)), mode='reflect')
        w_hwio = jnp.transpose(w, (2, 3, 1, 0))
        y = lax.conv_general_dilated(xp, w_hwio, (1, 1), 'VALID',
                                     dimension_numbers=('NHWC', 'HWIO', 'NHWC'))
        return jnp.where(y >= 0, y, 0.01 * y)

    x = conv(x, w1)
    x = conv(x, w2)
    return jnp.transpose(x, (0, 3, 1, 2))


if __name__ == "__main__":
    key = jax.random.PRNGKey(0)
    kx, k1, k2 = jax.random.split(key, 3)

    N, Cin, H, W = 2, 4, 16, 16
    Cout = 8

    x = jax.random.normal(kx, (N, Cin, H, W), dtype=jnp.float32)
    # Deterministic synthetic Conv2d weights (bias=False), PyTorch OIHW layout.
    w1 = 0.2 * jax.random.normal(k1, (Cin, Cin, 3, 3), dtype=jnp.float32)
    w2 = 0.2 * jax.random.normal(k2, (Cout, Cin, 3, 3), dtype=jnp.float32)

    out = jax.jit(downsampling_unit_forward)(x, w1, w2)
    out = jax.block_until_ready(out)

    ref = reference_forward(x, w1, w2)
    np.testing.assert_allclose(np.asarray(out), np.asarray(ref),
                               rtol=2e-2, atol=2e-2)
    assert out.shape == (N, Cout, H // 2, W // 2)
    print("KERNEL_OK")
</pallas_src>

<mosaic_0001>
module attributes {stable_mosaic.version = 11 : i64} {
  func.func @_down_unit_kernel(%arg0: i32, %arg1: memref<1x4x16x16xf32, #tpu.memory_space<vmem>>, %arg2: memref<4x36xf32, #tpu.memory_space<vmem>>, %arg3: memref<8x36xf32, #tpu.memory_space<vmem>>, %arg4: memref<1x8x64xf32, #tpu.memory_space<vmem>>) attributes {dimension_semantics = [#tpu.dimension_semantics<parallel>], iteration_bounds = array<i64: 2>, scalar_prefetch = 0 : i64, scratch_operands = 0 : i64, tpu.core_type = #tpu.core_type<tc>, window_params = [{transform_indices = @transform_0, window_bounds = array<i64: 1, 4, 16, 16>}, {pipeline_mode = #tpu.pipeline_mode<synchronous>, transform_indices = @transform_1, window_bounds = array<i64: 4, 36>}, {pipeline_mode = #tpu.pipeline_mode<synchronous>, transform_indices = @transform_2, window_bounds = array<i64: 8, 36>}, {transform_indices = @transform_3, window_bounds = array<i64: 1, 8, 64>}]} {
    %0 = tpu.iota {dimensions = array<i32: 0>} : vector<16x10xi32>
    %1 = tpu.iota {dimensions = array<i32: 1>} : vector<16x10xi32>
    %c0_i32 = arith.constant 0 : i32
    %2 = vector.broadcast %c0_i32 : i32 to vector<16x10xi32>
    %3 = arith.cmpi eq, %1, %2 : vector<16x10xi32>
    %c9_i32 = arith.constant 9 : i32
    %4 = vector.broadcast %c9_i32 : i32 to vector<16x10xi32>
    %5 = arith.cmpi eq, %1, %4 : vector<16x10xi32>
    %c1_i32 = arith.constant 1 : i32
    %6 = vector.broadcast %c1_i32 : i32 to vector<16x10xi32>
    %7 = arith.subi %1, %6 : vector<16x10xi32>
    %c6_i32 = arith.constant 6 : i32
    %8 = vector.broadcast %c6_i32 : i32 to vector<16x10xi32>
    %9 = arith.select %5, %8, %7 : vector<16x10xi1>, vector<16x10xi32>
    %c1_i32_0 = arith.constant 1 : i32
    %10 = vector.broadcast %c1_i32_0 : i32 to vector<16x10xi32>
    %11 = arith.select %3, %10, %9 : vector<16x10xi1>, vector<16x10xi32>
    %c2_i32 = arith.constant 2 : i32
    %12 = vector.broadcast %c2_i32 : i32 to vector<16x10xi32>
    %13 = arith.muli %12, %11 : vector<16x10xi32>
    %14 = arith.cmpi eq, %0, %13 : vector<16x10xi32>
    %15 = arith.extui %14 : vector<16x10xi1> to vector<16x10xi32>
    %16 = arith.sitofp %15 : vector<16x10xi32> to vector<16x10xf32>
    %c2_i32_1 = arith.constant 2 : i32
    %17 = vector.broadcast %c2_i32_1 : i32 to vector<16x10xi32>
    %18 = arith.muli %17, %11 : vector<16x10xi32>
    %c1_i32_2 = arith.constant 1 : i32
    %19 = vector.broadcast %c1_i32_2 : i32 to vector<16x10xi32>
    %20 = arith.addi %18, %19 : vector<16x10xi32>
    %21 = arith.cmpi eq, %0, %20 : vector<16x10xi32>
    %22 = arith.extui %21 : vector<16x10xi1> to vector<16x10xi32>
    %23 = arith.sitofp %22 : vector<16x10xi32> to vector<16x10xf32>
    %c0 = arith.constant 0 : index
    %c0_3 = arith.constant 0 : index
    %c0_4 = arith.constant 0 : index
    %c0_5 = arith.constant 0 : index
    %24 = vector.load %arg1[%c0, %c0_3, %c0_4, %c0_5] : memref<1x4x16x16xf32, #tpu.memory_space<vmem>>, vector<1x4x1x16xf32>
    %25 = vector.shape_cast %24 : vector<1x4x1x16xf32> to vector<4x16xf32>
    %c0_6 = arith.constant 0 : index
    %c0_7 = arith.constant 0 : index
    %c1 = arith.constant 1 : index
    %c0_8 = arith.constant 0 : index
    %26 = vector.load %arg1[%c0_6, %c0_7, %c1, %c0_8] : memref<1x4x16x16xf32, #tpu.memory_space<vmem>>, vector<1x4x1x16xf32>
    %27 = vector.shape_cast %26 : vector<1x4x1x16xf32> to vector<4x16xf32>
    %28 = arith.maximumf %25, %27 : vector<4x16xf32>
    %c0_9 = arith.constant 0 : index
    %c0_10 = arith.constant 0 : index
    %c2 = arith.constant 2 : index
    %c0_11 = arith.constant 0 : index
    %29 = vector.load %arg1[%c0_9, %c0_10, %c2, %c0_11] : memref<1x4x16x16xf32, #tpu.memory_space<vmem>>, vector<1x4x1x16xf32>
    %30 = vector.shape_cast %29 : vector<1x4x1x16xf32> to vector<4x16xf32>
    %c0_12 = arith.constant 0 : index
    %c0_13 = arith.constant 0 : index
    %c3 = arith.constant 3 : index
    %c0_14 = arith.constant 0 : index
    %31 = vector.load %arg1[%c0_12, %c0_13, %c3, %c0_14] : memref<1x4x16x16xf32, #tpu.memory_space<vmem>>, vector<1x4x1x16xf32>
    %32 = vector.shape_cast %31 : vector<1x4x1x16xf32> to vector<4x16xf32>
    %33 = arith.maximumf %30, %32 : vector<4x16xf32>
    %c0_15 = arith.constant 0 : index
    %c0_16 = arith.constant 0 : index
    %c4 = arith.constant 4 : index
    %c0_17 = arith.constant 0 : index
    %34 = vector.load %arg1[%c0_15, %c0_16, %c4, %c0_17] : memref<1x4x16x16xf32, #tpu.memory_space<vmem>>, vector<1x4x1x16xf32>
    %35 = vector.shape_cast %34 : vector<1x4x1x16xf32> to vector<4x16xf32>
    %c0_18 = arith.constant 0 : index
    %c0_19 = arith.constant 0 : index
    %c5 = arith.constant 5 : index
    %c0_20 = arith.constant 0 : index
    %36 = vector.load %arg1[%c0_18, %c0_19, %c5, %c0_20] : memref<1x4x16x16xf32, #tpu.memory_space<vmem>>, vector<1x4x1x16xf32>
    %37 = vector.shape_cast %36 : vector<1x4x1x16xf32> to vector<4x16xf32>
    %38 = arith.maximumf %35, %37 : vector<4x16xf32>
    %c0_21 = arith.constant 0 : index
    %c0_22 = arith.constant 0 : index
    %c6 = arith.constant 6 : index
    %c0_23 = arith.constant 0 : index
    %39 = vector.load %arg1[%c0_21, %c0_22, %c6, %c0_23] : memref<1x4x16x16xf32, #tpu.memory_space<vmem>>, vector<1x4x1x16xf32>
    %40 = vector.shape_cast %39 : vector<1x4x1x16xf32> to vector<4x16xf32>
    %c0_24 = arith.constant 0 : index
    %c0_25 = arith.constant 0 : index
    %c7 = arith.constant 7 : index
    %c0_26 = arith.constant 0 : index
    %41 = vector.load %arg1[%c0_24, %c0_25, %c7, %c0_26] : memref<1x4x16x16xf32, #tpu.memory_space<vmem>>, vector<1x4x1x16xf32>
    %42 = vector.shape_cast %41 : vector<1x4x1x16xf32> to vector<4x16xf32>
    %43 = arith.maximumf %40, %42 : vector<4x16xf32>
    %c0_27 = arith.constant 0 : index
    %c0_28 = arith.constant 0 : index
    %c8 = arith.constant 8 : index
    %c0_29 = arith.constant 0 : index
    %44 = vector.load %arg1[%c0_27, %c0_28, %c8, %c0_29] : memref<1x4x16x16xf32, #tpu.memory_space<vmem>>, vector<1x4x1x16xf32>
    %45 = vector.shape_cast %44 : vector<1x4x1x16xf32> to vector<4x16xf32>
    %c0_30 = arith.constant 0 : index
    %c0_31 = arith.constant 0 : index
    %c9 = arith.constant 9 : index
    %c0_32 = arith.constant 0 : index
    %46 = vector.load %arg1[%c0_30, %c0_31, %c9, %c0_32] : memref<1x4x16x16xf32, #tpu.memory_space<vmem>>, vector<1x4x1x16xf32>
    %47 = vector.shape_cast %46 : vector<1x4x1x16xf32> to vector<4x16xf32>
    %48 = arith.maximumf %45, %47 : vector<4x16xf32>
    %c0_33 = arith.constant 0 : index
    %c0_34 = arith.constant 0 : index
    %c10 = arith.constant 10 : index
    %c0_35 = arith.constant 0 : index
    %49 = vector.load %arg1[%c0_33, %c0_34, %c10, %c0_35] : memref<1x4x16x16xf32, #tpu.memory_space<vmem>>, vector<1x4x1x16xf32>
    %50 = vector.shape_cast %49 : vector<1x4x1x16xf32> to vector<4x16xf32>
    %c0_36 = arith.constant 0 : index
    %c0_37 = arith.constant 0 : index
    %c11 = arith.constant 11 : index
    %c0_38 = arith.constant 0 : index
    %51 = vector.load %arg1[%c0_36, %c0_37, %c11, %c0_38] : memref<1x4x16x16xf32, #tpu.memory_space<vmem>>, vector<1x4x1x16xf32>
    %52 = vector.shape_cast %51 : vector<1x4x1x16xf32> to vector<4x16xf32>
    %53 = arith.maximumf %50, %52 : vector<4x16xf32>
    %c0_39 = arith.constant 0 : index
    %c0_40 = arith.constant 0 : index
    %c12 = arith.constant 12 : index
    %c0_41 = arith.constant 0 : index
    %54 = vector.load %arg1[%c0_39, %c0_40, %c12, %c0_41] : memref<1x4x16x16xf32, #tpu.memory_space<vmem>>, vector<1x4x1x16xf32>
    %55 = vector.shape_cast %54 : vector<1x4x1x16xf32> to vector<4x16xf32>
    %c0_42 = arith.constant 0 : index
    %c0_43 = arith.constant 0 : index
    %c13 = arith.constant 13 : index
    %c0_44 = arith.constant 0 : index
    %56 = vector.load %arg1[%c0_42, %c0_43, %c13, %c0_44] : memref<1x4x16x16xf32, #tpu.memory_space<vmem>>, vector<1x4x1x16xf32>
    %57 = vector.shape_cast %56 : vector<1x4x1x16xf32> to vector<4x16xf32>
    %58 = arith.maximumf %55, %57 : vector<4x16xf32>
    %c0_45 = arith.constant 0 : index
    %c0_46 = arith.constant 0 : index
    %c14 = arith.constant 14 : index
    %c0_47 = arith.constant 0 : index
    %59 = vector.load %arg1[%c0_45, %c0_46, %c14, %c0_47] : memref<1x4x16x16xf32, #tpu.memory_space<vmem>>, vector<1x4x1x16xf32>
    %60 = vector.shape_cast %59 : vector<1x4x1x16xf32> to vector<4x16xf32>
    %c0_48 = arith.constant 0 : index
    %c0_49 = arith.constant 0 : index
    %c15 = arith.constant 15 : index
    %c0_50 = arith.constant 0 : index
    %61 = vector.load %arg1[%c0_48, %c0_49, %c15, %c0_50] : memref<1x4x16x16xf32, #tpu.memory_space<vmem>>, vector<1x4x1x16xf32>
    %62 = vector.shape_cast %61 : vector<1x4x1x16xf32> to vector<4x16xf32>
    %63 = arith.maximumf %60, %62 : vector<4x16xf32>
    %64 = tpu.concatenate %28, %33, %38, %43, %48, %53, %58, %63 in 0 : vector<4x16xf32>, vector<4x16xf32>, vector<4x16xf32>, vector<4x16xf32>, vector<4x16xf32>, vector<4x16xf32>, vector<4x16xf32>, vector<4x16xf32> -> vector<32x16xf32>
    %cst = arith.constant dense<0.000000e+00> : vector<32x10xf32>
    %65 = tpu.matmul %64, %16, %cst {dimension_numbers = #tpu.dot_dimension_numbers<[1], [0], [0], [1], [0, 0, 1, 1], [], []>} : vector<32x16xf32>, vector<16x10xf32>, vector<32x10xf32> -> vector<32x10xf32>
    %cst_51 = arith.constant dense<0.000000e+00> : vector<32x10xf32>
    %66 = tpu.matmul %64, %23, %cst_51 {dimension_numbers = #tpu.dot_dimension_numbers<[1], [0], [0], [1], [0, 0, 1, 1], [], []>} : vector<32x16xf32>, vector<16x10xf32>, vector<32x10xf32> -> vector<32x10xf32>
    %67 = arith.maximumf %65, %66 : vector<32x10xf32>
    %68 = vector.extract_strided_slice %67 {offsets = [0, 0], sizes = [4, 10], strides = [1, 1]} : vector<32x10xf32> to vector<4x10xf32>
    %69 = vector.extract_strided_slice %67 {offsets = [4, 0], sizes = [4, 10], strides = [1, 1]} : vector<32x10xf32> to vector<4x10xf32>
    %70 = vector.extract_strided_slice %67 {offsets = [8, 0], sizes = [4, 10], strides = [1, 1]} : vector<32x10xf32> to vector<4x10xf32>
    %71 = vector.extract_strided_slice %67 {offsets = [12, 0], sizes = [4, 10], strides = [1, 1]} : vector<32x10xf32> to vector<4x10xf32>
    %72 = vector.extract_strided_slice %67 {offsets = [16, 0], sizes = [4, 10], strides = [1, 1]} : vector<32x10xf32> to vector<4x10xf32>
    %73 = vector.extract_strided_slice %67 {offsets = [20, 0], sizes = [4, 10], strides = [1, 1]} : vector<32x10xf32> to vector<4x10xf32>
    %74 = vector.extract_strided_slice %67 {offsets = [24, 0], sizes = [4, 10], strides = [1, 1]} : vector<32x10xf32> to vector<4x10xf32>
    %75 = vector.extract_strided_slice %67 {offsets = [28, 0], sizes = [4, 10], strides = [1, 1]} : vector<32x10xf32> to vector<4x10xf32>
    %c0_52 = arith.constant 0 : index
    %c0_53 = arith.constant 0 : index
    %76 = vector.load %arg2[%c0_52, %c0_53] : memref<4x36xf32, #tpu.memory_space<vmem>>, vector<4x36xf32>
    %cst_54 = arith.constant 0.000000e+00 : f32
    %77 = vector.broadcast %cst_54 : f32 to vector<4x2xf32>
    %78 = tpu.concatenate %69, %68, %69, %70, %71, %72, %73, %74, %75, %74, %77 in 1 : vector<4x10xf32>, vector<4x10xf32>, vector<4x10xf32>, vector<4x10xf32>, vector<4x10xf32>, vector<4x10xf32>, vector<4x10xf32>, vector<4x10xf32>, vector<4x10xf32>, vector<4x10xf32>, vector<4x2xf32> -> vector<4x102xf32>
    %79 = vector.extract_strided_slice %78 {offsets = [0, 0], sizes = [4, 80], strides = [1, 1]} : vector<4x102xf32> to vector<4x80xf32>
    %80 = vector.extract_strided_slice %78 {offsets = [0, 1], sizes = [4, 80], strides = [1, 1]} : vector<4x102xf32> to vector<4x80xf32>
    %81 = vector.extract_strided_slice %78 {offsets = [0, 2], sizes = [4, 80], strides = [1, 1]} : vector<4x102xf32> to vector<4x80xf32>
    %82 = vector.extract_strided_slice %78 {offsets = [0, 10], sizes = [4, 80], strides = [1, 1]} : vector<4x102xf32> to vector<4x80xf32>
    %83 = vector.extract_strided_slice %78 {offsets = [0, 11], sizes = [4, 80], strides = [1, 1]} : vector<4x102xf32> to vector<4x80xf32>
    %84 = vector.extract_strided_slice %78 {offsets = [0, 12], sizes = [4, 80], strides = [1, 1]} : vector<4x102xf32> to vector<4x80xf32>
    %85 = vector.extract_strided_slice %78 {offsets = [0, 20], sizes = [4, 80], strides = [1, 1]} : vector<4x102xf32> to vector<4x80xf32>
    %86 = vector.extract_strided_slice %78 {offsets = [0, 21], sizes = [4, 80], strides = [1, 1]} : vector<4x102xf32> to vector<4x80xf32>
    %87 = vector.extract_strided_slice %78 {offsets = [0, 22], sizes = [4, 80], strides = [1, 1]} : vector<4x102xf32> to vector<4x80xf32>
    %88 = tpu.concatenate %79, %80, %81, %82, %83, %84, %85, %86, %87 in 0 : vector<4x80xf32>, vector<4x80xf32>, vector<4x80xf32>, vector<4x80xf32>, vector<4x80xf32>, vector<4x80xf32>, vector<4x80xf32>, vector<4x80xf32>, vector<4x80xf32> -> vector<36x80xf32>
    %cst_55 = arith.constant dense<0.000000e+00> : vector<4x80xf32>
    %89 = tpu.matmul %76, %88, %cst_55 {dimension_numbers = #tpu.dot_dimension_numbers<[1], [0], [0], [1], [0, 0, 1, 1], [], []>} : vector<4x36xf32>, vector<36x80xf32>, vector<4x80xf32> -> vector<4x80xf32>
    %cst_56 = arith.constant 0.00999999977 : f32
    %90 = vector.broadcast %cst_56 : f32 to vector<4x80xf32>
    %91 = arith.mulf %90, %89 : vector<4x80xf32>
    %92 = arith.maximumf %89, %91 : vector<4x80xf32>
    %93 = vector.extract_strided_slice %92 {offsets = [0, 0], sizes = [4, 8], strides = [1, 1]} : vector<4x80xf32> to vector<4x8xf32>
    %94 = vector.extract_strided_slice %92 {offsets = [0, 10], sizes = [4, 8], strides = [1, 1]} : vector<4x80xf32> to vector<4x8xf32>
    %95 = vector.extract_strided_slice %92 {offsets = [0, 20], sizes = [4, 8], strides = [1, 1]} : vector<4x80xf32> to vector<4x8xf32>
    %96 = vector.extract_strided_slice %92 {offsets = [0, 30], sizes = [4, 8], strides = [1, 1]} : vector<4x80xf32> to vector<4x8xf32>
    %97 = vector.extract_strided_slice %92 {offsets = [0, 40], sizes = [4, 8], strides = [1, 1]} : vector<4x80xf32> to vector<4x8xf32>
    %98 = vector.extract_strided_slice %92 {offsets = [0, 50], sizes = [4, 8], strides = [1, 1]} : vector<4x80xf32> to vector<4x8xf32>
    %99 = vector.extract_strided_slice %92 {offsets = [0, 60], sizes = [4, 8], strides = [1, 1]} : vector<4x80xf32> to vector<4x8xf32>
    %100 = vector.extract_strided_slice %92 {offsets = [0, 70], sizes = [4, 8], strides = [1, 1]} : vector<4x80xf32> to vector<4x8xf32>
    %101 = vector.extract_strided_slice %93 {offsets = [0, 1], sizes = [4, 1], strides = [1, 1]} : vector<4x8xf32> to vector<4x1xf32>
    %102 = vector.extract_strided_slice %93 {offsets = [0, 6], sizes = [4, 1], strides = [1, 1]} : vector<4x8xf32> to vector<4x1xf32>
    %103 = tpu.concatenate %101, %93, %102 in 1 : vector<4x1xf32>, vector<4x8xf32>, vector<4x1xf32> -> vector<4x10xf32>
    %104 = vector.extract_strided_slice %94 {offsets = [0, 1], sizes = [4, 1], strides = [1, 1]} : vector<4x8xf32> to vector<4x1xf32>
    %105 = vector.extract_strided_slice %94 {offsets = [0, 6], sizes = [4, 1], strides = [1, 1]} : vector<4x8xf32> to vector<4x1xf32>
    %106 = tpu.concatenate %104, %94, %105 in 1 : vector<4x1xf32>, vector<4x8xf32>, vector<4x1xf32> -> vector<4x10xf32>
    %107 = vector.extract_strided_slice %95 {offsets = [0, 1], sizes = [4, 1], strides = [1, 1]} : vector<4x8xf32> to vector<4x1xf32>
    %108 = vector.extract_strided_slice %95 {offsets = [0, 6], sizes = [4, 1], strides = [1, 1]} : vector<4x8xf32> to vector<4x1xf32>
    %109 = tpu.concatenate %107, %95, %108 in 1 : vector<4x1xf32>, vector<4x8xf32>, vector<4x1xf32> -> vector<4x10xf32>
    %110 = vector.extract_strided_slice %96 {offsets = [0, 1], sizes = [4, 1], strides = [1, 1]} : vector<4x8xf32> to vector<4x1xf32>
    %111 = vector.extract_strided_slice %96 {offsets = [0, 6], sizes = [4, 1], strides = [1, 1]} : vector<4x8xf32> to vector<4x1xf32>
    %112 = tpu.concatenate %110, %96, %111 in 1 : vector<4x1xf32>, vector<4x8xf32>, vector<4x1xf32> -> vector<4x10xf32>
    %113 = vector.extract_strided_slice %97 {offsets = [0, 1], sizes = [4, 1], strides = [1, 1]} : vector<4x8xf32> to vector<4x1xf32>
    %114 = vector.extract_strided_slice %97 {offsets = [0, 6], sizes = [4, 1], strides = [1, 1]} : vector<4x8xf32> to vector<4x1xf32>
    %115 = tpu.concatenate %113, %97, %114 in 1 : vector<4x1xf32>, vector<4x8xf32>, vector<4x1xf32> -> vector<4x10xf32>
    %116 = vector.extract_strided_slice %98 {offsets = [0, 1], sizes = [4, 1], strides = [1, 1]} : vector<4x8xf32> to vector<4x1xf32>
    %117 = vector.extract_strided_slice %98 {offsets = [0, 6], sizes = [4, 1], strides = [1, 1]} : vector<4x8xf32> to vector<4x1xf32>
    %118 = tpu.concatenate %116, %98, %117 in 1 : vector<4x1xf32>, vector<4x8xf32>, vector<4x1xf32> -> vector<4x10xf32>
    %119 = vector.extract_strided_slice %99 {offsets = [0, 1], sizes = [4, 1], strides = [1, 1]} : vector<4x8xf32> to vector<4x1xf32>
    %120 = vector.extract_strided_slice %99 {offsets = [0, 6], sizes = [4, 1], strides = [1, 1]} : vector<4x8xf32> to vector<4x1xf32>
    %121 = tpu.concatenate %119, %99, %120 in 1 : vector<4x1xf32>, vector<4x8xf32>, vector<4x1xf32> -> vector<4x10xf32>
    %122 = vector.extract_strided_slice %100 {offsets = [0, 1], sizes = [4, 1], strides = [1, 1]} : vector<4x8xf32> to vector<4x1xf32>
    %123 = vector.extract_strided_slice %100 {offsets = [0, 6], sizes = [4, 1], strides = [1, 1]} : vector<4x8xf32> to vector<4x1xf32>
    %124 = tpu.concatenate %122, %100, %123 in 1 : vector<4x1xf32>, vector<4x8xf32>, vector<4x1xf32> -> vector<4x10xf32>
    %c0_57 = arith.constant 0 : index
    %c0_58 = arith.constant 0 : index
    %125 = vector.load %arg3[%c0_57, %c0_58] : memref<8x36xf32, #tpu.memory_space<vmem>>, vector<8x36xf32>
    %cst_59 = arith.constant 0.000000e+00 : f32
    %126 = vector.broadcast %cst_59 : f32 to vector<4x2xf32>
    %127 = tpu.concatenate %106, %103, %106, %109, %112, %115, %118, %121, %124, %121, %126 in 1 : vector<4x10xf32>, vector<4x10xf32>, vector<4x10xf32>, vector<4x10xf32>, vector<4x10xf32>, vector<4x10xf32>, vector<4x10xf32>, vector<4x10xf32>, vector<4x10xf32>, vector<4x10xf32>, vector<4x2xf32> -> vector<4x102xf32>
    %128 = vector.extract_strided_slice %127 {offsets = [0, 0], sizes = [4, 80], strides = [1, 1]} : vector<4x102xf32> to vector<4x80xf32>
    %129 = vector.extract_strided_slice %127 {offsets = [0, 1], sizes = [4, 80], strides = [1, 1]} : vector<4x102xf32> to vector<4x80xf32>
    %130 = vector.extract_strided_slice %127 {offsets = [0, 2], sizes = [4, 80], strides = [1, 1]} : vector<4x102xf32> to vector<4x80xf32>
    %131 = vector.extract_strided_slice %127 {offsets = [0, 10], sizes = [4, 80], strides = [1, 1]} : vector<4x102xf32> to vector<4x80xf32>
    %132 = vector.extract_strided_slice %127 {offsets = [0, 11], sizes = [4, 80], strides = [1, 1]} : vector<4x102xf32> to vector<4x80xf32>
    %133 = vector.extract_strided_slice %127 {offsets = [0, 12], sizes = [4, 80], strides = [1, 1]} : vector<4x102xf32> to vector<4x80xf32>
    %134 = vector.extract_strided_slice %127 {offsets = [0, 20], sizes = [4, 80], strides = [1, 1]} : vector<4x102xf32> to vector<4x80xf32>
    %135 = vector.extract_strided_slice %127 {offsets = [0, 21], sizes = [4, 80], strides = [1, 1]} : vector<4x102xf32> to vector<4x80xf32>
    %136 = vector.extract_strided_slice %127 {offsets = [0, 22], sizes = [4, 80], strides = [1, 1]} : vector<4x102xf32> to vector<4x80xf32>
    %137 = tpu.concatenate %128, %129, %130, %131, %132, %133, %134, %135, %136 in 0 : vector<4x80xf32>, vector<4x80xf32>, vector<4x80xf32>, vector<4x80xf32>, vector<4x80xf32>, vector<4x80xf32>, vector<4x80xf32>, vector<4x80xf32>, vector<4x80xf32> -> vector<36x80xf32>
    %cst_60 = arith.constant dense<0.000000e+00> : vector<8x80xf32>
    %138 = tpu.matmul %125, %137, %cst_60 {dimension_numbers = #tpu.dot_dimension_numbers<[1], [0], [0], [1], [0, 0, 1, 1], [], []>} : vector<8x36xf32>, vector<36x80xf32>, vector<8x80xf32> -> vector<8x80xf32>
    %cst_61 = arith.constant 0.00999999977 : f32
    %139 = vector.broadcast %cst_61 : f32 to vector<8x80xf32>
    %140 = arith.mulf %139, %138 : vector<8x80xf32>
    %141 = arith.maximumf %138, %140 : vector<8x80xf32>
    %142 = vector.extract_strided_slice %141 {offsets = [0, 0], sizes = [8, 8], strides = [1, 1]} : vector<8x80xf32> to vector<8x8xf32>
    %143 = vector.extract_strided_slice %141 {offsets = [0, 10], sizes = [8, 8], strides = [1, 1]} : vector<8x80xf32> to vector<8x8xf32>
    %144 = vector.extract_strided_slice %141 {offsets = [0, 20], sizes = [8, 8], strides = [1, 1]} : vector<8x80xf32> to vector<8x8xf32>
    %145 = vector.extract_strided_slice %141 {offsets = [0, 30], sizes = [8, 8], strides = [1, 1]} : vector<8x80xf32> to vector<8x8xf32>
    %146 = vector.extract_strided_slice %141 {offsets = [0, 40], sizes = [8, 8], strides = [1, 1]} : vector<8x80xf32> to vector<8x8xf32>
    %147 = vector.extract_strided_slice %141 {offsets = [0, 50], sizes = [8, 8], strides = [1, 1]} : vector<8x80xf32> to vector<8x8xf32>
    %148 = vector.extract_strided_slice %141 {offsets = [0, 60], sizes = [8, 8], strides = [1, 1]} : vector<8x80xf32> to vector<8x8xf32>
    %149 = vector.extract_strided_slice %141 {offsets = [0, 70], sizes = [8, 8], strides = [1, 1]} : vector<8x80xf32> to vector<8x8xf32>
    %150 = tpu.concatenate %142, %143, %144, %145, %146, %147, %148, %149 in 1 : vector<8x8xf32>, vector<8x8xf32>, vector<8x8xf32>, vector<8x8xf32>, vector<8x8xf32>, vector<8x8xf32>, vector<8x8xf32>, vector<8x8xf32> -> vector<8x64xf32>
    %c0_62 = arith.constant 0 : index
    %c0_63 = arith.constant 0 : index
    %c0_64 = arith.constant 0 : index
    %151 = vector.load %arg4[%c0_62, %c0_63, %c0_64] : memref<1x8x64xf32, #tpu.memory_space<vmem>>, vector<1x8x64xf32>
    %152 = vector.shape_cast %151 : vector<1x8x64xf32> to vector<8x64xf32>
    %153 = vector.shape_cast %150 : vector<8x64xf32> to vector<1x8x64xf32>
    tpu.vector_store %arg4[%c0_62, %c0_63, %c0_64], %153 {strides = array<i32>} : memref<1x8x64xf32, #tpu.memory_space<vmem>>, vector<1x8x64xf32>,
    return
  }
  func.func @transform_0(%arg0: i32) -> (i32, i32, i32, i32) {
    %c0_i32 = arith.constant 0 : i32
    %c0_i32_0 = arith.constant 0 : i32
    %c0_i32_1 = arith.constant 0 : i32
    %c0_i32_2 = arith.constant 0 : i32
    return %arg0, %c0_i32, %c0_i32_0, %c0_i32_1 : i32, i32, i32, i32
  }
  func.func @transform_1(%arg0: i32) -> (i32, i32) {
    %c0_i32 = arith.constant 0 : i32
    %c0_i32_0 = arith.constant 0 : i32
    %c0_i32_1 = arith.constant 0 : i32
    return %c0_i32, %c0_i32_0 : i32, i32
  }
  func.func @transform_2(%arg0: i32) -> (i32, i32) {
    %c0_i32 = arith.constant 0 : i32
    %c0_i32_0 = arith.constant 0 : i32
    %c0_i32_1 = arith.constant 0 : i32
    return %c0_i32, %c0_i32_0 : i32, i32
  }
  func.func @transform_3(%arg0: i32) -> (i32, i32, i32) {
    %c0_i32 = arith.constant 0 : i32
    %c0_i32_0 = arith.constant 0 : i32
    %c0_i32_1 = arith.constant 0 : i32
    return %arg0, %c0_i32, %c0_i32_0 : i32, i32, i32
  }
}

</mosaic_0001>

<bundles_post_ra>
// kernel: downsampling_unit_forward.1
= control target key start
LH: loop header
LB: loop body
LE: loop exit
PB: predicated region body
PF: predicated region fallthrough
CT: control target
= control target key end

     0   :  { %s1303_s12 = smov 0   ;;  %s1543_s0 = inlined_call_operand.vmem [shape: f32[2,4,16,16], index: 0, kind: input, shape index: {}]   ;;  %s1544_s1 = inlined_call_operand.vmem [shape: f32[4,36], index: 1, kind: input, shape index: {}]   ;;  %s1545_s2 = inlined_call_operand.vmem [shape: f32[8,36], index: 2, kind: input, shape index: {}]   ;;  %s1546_s3 = inlined_call_operand.vmem [shape: f32[2,8,64], index: 3, kind: output, shape index: {}]  }
   0x1 LB: > { %s1075_s13 = sadd.s32 4294967295, %s1236_s12   ;;  %p1079_p0 = scmp.ge.s32.totalorder %s1236_s12, 1  ;;  %s1236_s12 = sphi %s1303_s12, %s13_s12  }
   0x2   : > { %p137_p1 = scmp.lt.s32.totalorder %s1236_s12, 3 }
   0x4   : > { %p138_p2 = pnand %p1079_p0, %p137_p1 }
   0x5   : > { %p160_p3 = scmp.lt.s32.totalorder (!%p138_p2), %s1075_s13, 1  ;;  %s1239_s18 = smov (!%p138_p2), 40  }
   0x6   : > { %141 = sbr.rel (%p138_p2) target bundleno = 1436 (0x59c), region = 32  ;;  %s1240_s19 = smov (!%p138_p2), 20  }
   0x7   : > { %s1241_s20 = smov (!%p138_p2), 30   ;;  %s1242_s21 = smov (!%p138_p2), 10  }
   0x8   : > { %s1243_s22 = smov (!%p138_p2), 60   ;;  %s1244_s23 = smov (!%p138_p2), 70  }
   0x9   : > { %s1245_s24 = smov (!%p138_p2), 80   ;;  %s1246_s25 = smov (!%p138_p2), 50  }
   0xa   : > { %s1247_s26 = smov (!%p138_p2), 90   ;;  %s1249_s27 = smov (!%p138_p2), 107  }
   0xb   : > { %v169_v0 = vlaneseq  ;;  %s1556_s13 = smov (!%p160_p3, %s1075_s13), 1  ;;  %vm294_vm2 = vcmask 1041409   ;;  %vm297_vm3 = vcmask 1042434   ;;  %vm300_vm4 = vcmask 1043459   ;;  %s1250_s28 = smov 108  }
   0xc   : > { %s1106_s14 = sshll.u32 %s1556_s13, 6  ;;  %vm309_vm5 = vcmask 1045509   ;;  %vm312_vm6 = vcmask 1046534   ;;  %vm315_vm7 = vcmask 1047559   ;;  %vm387_vm8 = vcmask 1043456   ;;  %s1252_s29 = smov 106  }
   0xd   : > { %v1311_v1 = vshrl.u32 %v169_v0, 7  ;;  %v173_v2 = vand.u32 127, %v169_v0  ;;  %s1319_s17 = scalar_lea.vmem %s1543_s0, %s1106_s14  ;;  %vm392_vm9 = vcmask 130048   ;;  %v1238_v23 = vmov 1.0   ;;  %s1253_s30 = smov 117  }
   0xe   : > { %v193_v6 = vld [vmem:[%s1319_s17] sm:$0x1]  ;;  %v194_v7 = vld [vmem:[%s1319_s17 + $0x10] sm:$0x1]  ;;  %v197_v12 = vld [vmem:[%s1319_s17 + $0x1] sm:$0x1] }
   0xf   : > { %vm174_vm0 = vcmp.eq.s32.totalorder %v173_v2, 0  ;;  %vm175_vm1 = vcmp.eq.s32.totalorder %v173_v2, 9  ;;  %v1083_v3 = vadd.s32 4294967295, %v173_v2  ;;  %v171_v4 = vadd.s32 8, %v1311_v1  ;;  %v195_v9 = vld [vmem:[%s1319_s17 + $0x20] sm:$0x1] }
  0x10   : > { %v196_v10 = vld [vmem:[%s1319_s17 + $0x30] sm:$0x1]  ;;  %v198_v13 = vld [vmem:[%s1319_s17 + $0x11] sm:$0x1]  ;;  %v199_v14 = vld [vmem:[%s1319_s17 + $0x21] sm:$0x1]  ;;  %v201_v16 = vmax.f32 %v193_v6, %v197_v12 }
  0x11   : > { %v177_v5 = vsel %vm175_vm1, 6, %v1083_v3  ;;  %v200_v15 = vld [vmem:[%s1319_s17 + $0x31] sm:$0x1]  ;;  %v202_v17 = vmax.f32 %v194_v7, %v198_v13  ;;  %v205_v18 = vld [vmem:[%s1319_s17 + $0x2] sm:$0x1]  ;;  %v203_v20 = vmax.f32 %v195_v9, %v199_v14  ;;  %vm615_vm14 = vcmask 80896  }
  0x12   : > { %v178_v8 = vsel %vm174_vm0, 1, %v177_v5  ;;  %v206_v21 = vld [vmem:[%s1319_s17 + $0x12] sm:$0x1]  ;;  %v207_v22 = vld [vmem:[%s1319_s17 + $0x22] sm:$0x1]  ;;  %v204_v24 = vmax.f32 %v196_v10, %v200_v15  ;;  %vm617_vm15 = vcmask 162816  }
  0x13   : > { %v179_v11 = vmul.u32 2, %v178_v8  ;;  %v208_v25 = vld [vmem:[%s1319_s17 + $0x32] sm:$0x1]  ;;  %v209_v26 = vld [vmem:[%s1319_s17 + $0x3] sm:$0x1]  ;;  %v293_v32 = vrot.slane %v202_v17, 7 }
  0x14   : > { %v210_v27 = vld [vmem:[%s1319_s17 + $0x13] sm:$0x1]  ;;  %v211_v28 = vld [vmem:[%s1319_s17 + $0x23] sm:$0x1]  ;;  %v213_v30 = vmax.f32 %v205_v18, %v209_v26  ;;  %v296_v35 = vrot.slane %v203_v20, 6  ;;  %v299_v36 = vrot.slane %v204_v24, 5 }
  0x15   : > { %vm181_vm10 = vcmp.eq.s32.totalorder %v171_v4, %v179_v11  ;;  %v186_v19 = vadd.s32 1, %v179_v11  ;;  %vm180_vm11 = vcmp.eq.s32.totalorder %v1311_v1, %v179_v11  ;;  %v212_v29 = vld [vmem:[%s1319_s17 + $0x33] sm:$0x1]  ;;  %v214_v31 = vmax.f32 %v206_v21, %v210_v27  ;;  %v217_v37 = vld [vmem:[%s1319_s17 + $0x4] sm:$0x1]  ;;  %s1550_s4 = smov 116  }
  0x16   : > { %1131 = vmatprep.subr.msk.mxu0 %vm181_vm10, %v1238_v23  ;;  %v215_v33 = vmax.f32 %v207_v22, %v211_v28  ;;  %v216_v34 = vmax.f32 %v208_v25, %v212_v29  ;;  %v218_v38 = vld [vmem:[%s1319_s17 + $0x14] sm:$0x1]  ;;  %v295_v39 = vsel %vm294_vm2, %v293_v32, %v201_v16  ;;  %v307_v40 = vrot.slane %v213_v30, 4  ;;  %v219_v42 = vld [vmem:[%s1319_s17 + $0x24] sm:$0x1]  ;;  %s1255_s5 = smov 126  }
  0x17   : > { %1132 = vmatpush3.msk.msra.mxu0 %vm181_vm10, %v1238_v23  ;;  %vm188_vm12 = vcmp.eq.s32.totalorder %v171_v4, %v186_v19  ;;  %v308_v41 = vrot.slane %v214_v31, 3  ;;  %vm187_vm13 = vcmp.eq.s32.totalorder %v1311_v1, %v186_v19  ;;  %v220_v43 = vld [vmem:[%s1319_s17 + $0x34] sm:$0x1]  ;;  %v298_v44 = vsel %vm297_vm3, %v296_v35, %v295_v39  ;;  %v221_v47 = vld [vmem:[%s1319_s17 + $0x5] sm:$0x1]  ;;  %s1547_s6 = smov 118  }
  0x18   : > { %1141 = vmatprep.subr.msk.mxu1 %vm188_vm12, %v1238_v23  ;;  %1133 = vmatprep.subr.msk.mxu0 %vm180_vm11, %v1238_v23  ;;  %v311_v45 = vrot.slane %v215_v33, 2  ;;  %v314_v46 = vrot.slane %v216_v34, 1  ;;  %v222_v48 = vld [vmem:[%s1319_s17 + $0x15] sm:$0x1]  ;;  %v301_v49 = vsel %vm300_vm4, %v299_v36, %v298_v44  ;;  %v223_v51 = vld [vmem:[%s1319_s17 + $0x25] sm:$0x1]  ;;  %v225_v62 = vmax.f32 %v217_v37, %v221_v47 }
  0x19   : > { %1142 = vmatpush3.msk.msra.mxu1 %vm188_vm12, %v1238_v23  ;;  %1134 = vmatpush3.msk.msra.mxu0 %vm180_vm11, %v1238_v23  ;;  %v310_v50 = vsel %vm309_vm5, %v308_v41, %v307_v40  ;;  %v224_v52 = vld [vmem:[%s1319_s17 + $0x35] sm:$0x1]  ;;  %v226_v53 = vmax.f32 %v218_v38, %v222_v48  ;;  %v229_v54 = vld [vmem:[%s1319_s17 + $0x6] sm:$0x1]  ;;  %v227_v56 = vmax.f32 %v219_v42, %v223_v51  ;;  %v230_v58 = vld [vmem:[%s1319_s17 + $0x16] sm:$0x1] }
  0x1a   : > { %1143 = vmatprep.subr.msk.mxu1 %vm187_vm13, %v1238_v23  ;;  %v313_v55 = vsel %vm312_vm6, %v311_v45, %v310_v50  ;;  %v228_v57 = vmax.f32 %v220_v43, %v224_v52  ;;  %v231_v59 = vld [vmem:[%s1319_s17 + $0x26] sm:$0x1]  ;;  %v232_v60 = vld [vmem:[%s1319_s17 + $0x36] sm:$0x1]  ;;  %v233_v63 = vld [vmem:[%s1319_s17 + $0x7] sm:$0x1] }
  0x1b   : > { %1144 = vmatpush3.msk.msra.mxu1 %vm187_vm13, %v1238_v23  ;;  %v316_v61 = vsel %vm315_vm7, %v314_v46, %v313_v55  ;;  %v234_v0 = vld [vmem:[%s1319_s17 + $0x17] sm:$0x1]  ;;  %v235_v1 = vld [vmem:[%s1319_s17 + $0x27] sm:$0x1]  ;;  %v237_v4 = vmax.f32 %v229_v54, %v233_v63  ;;  %v242_v7 = vld [vmem:[%s1319_s17 + $0x18] sm:$0x1] }
  0x1c   : > { %v388_v2 = vsel %vm387_vm8, %v301_v49, %v316_v61  ;;  %v236_v3 = vld [vmem:[%s1319_s17 + $0x37] sm:$0x1]  ;;  %v238_v5 = vmax.f32 %v230_v58, %v234_v0  ;;  %v239_v6 = vmax.f32 %v231_v59, %v235_v1  ;;  %v322_v9 = vrot.slane %v226_v53, 7  ;;  %v241_v12 = vld [vmem:[%s1319_s17 + $0x8] sm:$0x1]  ;;  %s1549_s7 = smov 127  }
  0x1d   : > { %1135 = vmatprep.mubr.msk.f32.mxu0 %vm392_vm9, %v388_v2  ;;  %v240_v8 = vmax.f32 %v232_v60, %v236_v3  ;;  %v324_v10 = vrot.slane %v227_v56, 6  ;;  %v326_v11 = vrot.slane %v228_v57, 5  ;;  %1145 = vmatprep.mubr.msk.f32.mxu1 %vm392_vm9, %v388_v2  ;;  %v243_v13 = vld [vmem:[%s1319_s17 + $0x28] sm:$0x1]  ;;  %v333_v14 = vrot.slane %v237_v4, 4  ;;  %s1258_s10 = smov 1  }
  0x1e   : > { %v334_v15 = vrot.slane %v238_v5, 3  ;;  %v336_v16 = vrot.slane %v239_v6, 2  ;;  %v244_v17 = vld [vmem:[%s1319_s17 + $0x38] sm:$0x1]  ;;  %v323_v18 = vsel %vm294_vm2, %v322_v9, %v225_v62  ;;  %v245_v20 = vld [vmem:[%s1319_s17 + $0x9] sm:$0x1] }
  0x1f   : > { %v338_v19 = vrot.slane %v240_v8, 1  ;;  %v246_v21 = vld [vmem:[%s1319_s17 + $0x19] sm:$0x1]  ;;  %v325_v22 = vsel %vm297_vm3, %v324_v10, %v323_v18  ;;  %v247_v24 = vld [vmem:[%s1319_s17 + $0x29] sm:$0x1]  ;;  %v249_v36 = vmax.f32 %v241_v12, %v245_v20  ;;  %vm619_vm0 = vcmask 244736  }
  0x20   : > { %v335_v23 = vsel %vm309_vm5, %v334_v15, %v333_v14  ;;  %v248_v25 = vld [vmem:[%s1319_s17 + $0x39] sm:$0x1]  ;;  %v250_v26 = vmax.f32 %v242_v7, %v246_v21  ;;  %v253_v27 = vld [vmem:[%s1319_s17 + $0xa] sm:$0x1]  ;;  %v327_v28 = vsel %vm300_vm4, %v326_v11, %v325_v22  ;;  %v251_v30 = vmax.f32 %v243_v13, %v247_v24  ;;  %v254_v32 = vld [vmem:[%s1319_s17 + $0x1a] sm:$0x1] }
  0x21   : > { %v337_v29 = vsel %vm312_vm6, %v336_v16, %v335_v23  ;;  %v252_v31 = vmax.f32 %v244_v17, %v248_v25  ;;  %v255_v33 = vld [vmem:[%s1319_s17 + $0x2a] sm:$0x1]  ;;  %v256_v34 = vld [vmem:[%s1319_s17 + $0x3a] sm:$0x1]  ;;  %v257_v37 = vld [vmem:[%s1319_s17 + $0xb] sm:$0x1] }
  0x22   : > { %v339_v35 = vsel %vm315_vm7, %v338_v19, %v337_v29  ;;  %v258_v38 = vld [vmem:[%s1319_s17 + $0x1b] sm:$0x1]  ;;  %v259_v39 = vld [vmem:[%s1319_s17 + $0x2b] sm:$0x1]  ;;  %v261_v42 = vmax.f32 %v253_v27, %v257_v37  ;;  %v266_v45 = vld [vmem:[%s1319_s17 + $0x1c] sm:$0x1] }
  0x23   : > { %v389_v40 = vsel %vm387_vm8, %v327_v28, %v339_v35  ;;  %v260_v41 = vld [vmem:[%s1319_s17 + $0x3b] sm:$0x1]  ;;  %v262_v43 = vmax.f32 %v254_v32, %v258_v38  ;;  %v263_v44 = vmax.f32 %v255_v33, %v259_v39  ;;  %v345_v47 = vrot.slane %v250_v26, 7  ;;  %v265_v50 = vld [vmem:[%s1319_s17 + $0xc] sm:$0x1]  ;;  %s1259_s11 = smov 3  }
  0x24   : > { %1136 = vmatmul.mubr.msk.f32.vlgmr.msra.gmra.mxu0 %vm392_vm9, %v389_v40  ;;  %1146 = vmatmul.mubr.msk.f32.vlgmr.msra.gmra.mxu1 %vm392_vm9, %v389_v40  ;;  %v264_v46 = vmax.f32 %v256_v34, %v260_v41  ;;  %v347_v48 = vrot.slane %v251_v30, 6  ;;  %v349_v49 = vrot.slane %v252_v31, 5  ;;  %v267_v51 = vld [vmem:[%s1319_s17 + $0x2c] sm:$0x1]  ;;  %v356_v52 = vrot.slane %v261_v42, 4  ;;  %s1260_s14 = smov 121  }
  0x25   : > { %v357_v53 = vrot.slane %v262_v43, 3  ;;  %v359_v54 = vrot.slane %v263_v44, 2  ;;  %v268_v55 = vld [vmem:[%s1319_s17 + $0x3c] sm:$0x1]  ;;  %v346_v56 = vsel %vm294_vm2, %v345_v47, %v249_v36  ;;  %v269_v58 = vld [vmem:[%s1319_s17 + $0xd] sm:$0x1] }
  0x26   : > { %v361_v57 = vrot.slane %v264_v46, 1  ;;  %v270_v59 = vld [vmem:[%s1319_s17 + $0x1d] sm:$0x1]  ;;  %v348_v60 = vsel %vm297_vm3, %v347_v48, %v346_v56  ;;  %v271_v62 = vld [vmem:[%s1319_s17 + $0x2d] sm:$0x1]  ;;  %v273_v10 = vmax.f32 %v265_v50, %v269_v58  ;;  %vm621_vm1 = vcmask 326656  }
  0x27   : > { %v358_v61 = vsel %vm309_vm5, %v357_v53, %v356_v52  ;;  %v272_v63 = vld [vmem:[%s1319_s17 + $0x3d] sm:$0x1]  ;;  %v274_v0 = vmax.f32 %v266_v45, %v270_v59  ;;  %v277_v1 = vld [vmem:[%s1319_s17 + $0xe] sm:$0x1]  ;;  %v350_v2 = vsel %vm300_vm4, %v349_v49, %v348_v60  ;;  %v275_v4 = vmax.f32 %v267_v51, %v271_v62  ;;  %v278_v6 = vld [vmem:[%s1319_s17 + $0x1e] sm:$0x1] }
  0x28   : > { %v360_v3 = vsel %vm312_vm6, %v359_v54, %v358_v61  ;;  %v276_v5 = vmax.f32 %v268_v55, %v272_v63  ;;  %v279_v7 = vld [vmem:[%s1319_s17 + $0x2e] sm:$0x1]  ;;  %v280_v8 = vld [vmem:[%s1319_s17 + $0x3e] sm:$0x1]  ;;  %v281_v11 = vld [vmem:[%s1319_s17 + $0xf] sm:$0x1] }
  0x29   : > { %v362_v9 = vsel %vm315_vm7, %v361_v57, %v360_v3  ;;  %v282_v12 = vld [vmem:[%s1319_s17 + $0x1f] sm:$0x1]  ;;  %v283_v13 = vld [vmem:[%s1319_s17 + $0x2f] sm:$0x1]  ;;  %v285_v16 = vmax.f32 %v277_v1, %v281_v11  ;;  %v368_v20 = vrot.slane %v274_v0, 7  ;;  %v370_v21 = vrot.slane %v275_v4, 6 }
  0x2a   : > { %v390_v14 = vsel %vm387_vm8, %v350_v2, %v362_v9  ;;  %v284_v15 = vld [vmem:[%s1319_s17 + $0x3f] sm:$0x1]  ;;  %v286_v17 = vmax.f32 %v278_v6, %v282_v12  ;;  %v287_v18 = vmax.f32 %v279_v7, %v283_v13  ;;  %v372_v22 = vrot.slane %v276_v5, 5  ;;  %s1261_s15 = smov 119   ;;  %s1262_s16 = smov 109  }
  0x2b   : > { %1138 = vmatprep.mubr.msk.f32.mxu0 %vm392_vm9, %v390_v14  ;;  %1148 = vmatprep.mubr.msk.f32.mxu1 %vm392_vm9, %v390_v14  ;;  %v288_v19 = vmax.f32 %v280_v8, %v284_v15  ;;  %v379_v23 = vrot.slane %v285_v16, 4  ;;  %v369_v26 = vsel %vm294_vm2, %v368_v20, %v273_v10  ;;  %v1248_v59 = vmov 0.0   ;;  %s1263_s17 = smov 97   ;;  %s1264_s8 = smov 111  }
  0x2c   : > { %v380_v24 = vrot.slane %v286_v17, 3  ;;  %v382_v25 = vrot.slane %v287_v18, 2  ;;  %v371_v28 = vsel %vm297_vm3, %v370_v21, %v369_v26  ;;  %1151 = vmatprep.subr.mxu0 %v1248_v59  ;;  %1164 = vmatprep.subr.mxu1 %v1248_v59  ;;  %vm623_vm2 = vcmask 408576   ;;  %v579_v18 = vld [vmem:[%s1544_s1] sm:$0xf]  ;;  %s1265_s9 = smov 101  }
  0x2d   : > { %v384_v27 = vrot.slane %v288_v19, 1  ;;  %v373_v30 = vsel %vm300_vm4, %v372_v22, %v371_v28  ;;  %vm625_vm3 = vcmask 490496   ;;  %vm627_vm4 = vcmask 572416  }
  0x2e   : > { %v381_v29 = vsel %vm309_vm5, %v380_v24, %v379_v23  ;;  %vm629_vm5 = vcmask 654336   ;;  %vm1251_vm10 = vmmov 0   ;;  %vm665_vm11 = vcmask 293888  }
  0x2f   : > { %v383_v31 = vsel %vm312_vm6, %v382_v25, %v381_v29  ;;  %vm631_vm6 = vcmask 736256   ;;  %vm753_vm12 = vcmask 7168   ;;  %vm755_vm13 = vcmask 72704  }
  0x30   : > { %v385_v32 = vsel %vm315_vm7, %v384_v27, %v383_v31  ;;  %vm633_vm7 = vcmask 818176  }
  0x31   : > { %v391_v33 = vsel %vm387_vm8, %v373_v30, %v385_v32 }
  0x32   : > { %1139 = vmatmul.mubr.msk.f32.gmra.mxu0 %vm392_vm9, %v391_v33  ;;  %1149 = vmatmul.mubr.msk.f32.gmra.mxu1 %vm392_vm9, %v391_v33 }
  0x33   : > { %1161 = vmatprep.mubr.msk.f32.mxu0 %vm1251_vm10, %v1248_v59  ;;  %1174 = vmatprep.mubr.msk.f32.mxu1 %vm1251_vm10, %v1248_v59 }
  0xe4   : > { %v1137_v34 = vpop.f32.mrf.mxu0  ;;  %v1147_v35 = vpop.f32.mrf.mxu1 }
  0xe5   : > { %v576_v36 = vmax.f32 %v1137_v34, %v1147_v35 }
  0xe6   : > { %v471_v37 = vpop.f32.mrf.mxu0  ;;  %v556_v38 = vpop.f32.mrf.mxu1 }
  0xe7   : > { %v575_v39 = vmax.f32 %v471_v37, %v556_v38  ;;  %593 = vrot.lane.b32.xlu1 %v576_v36, %s1239_s18  ;;  %v589_v40 = vrot.slane %v576_v36, 4 }
  0xe9   : > { %585 = vrot.lane.b32.xlu0 %v575_v39, %s1240_s19  ;;  %v581_v41 = vrot.slane %v575_v39, 4 }
  0xeb   : > { %590 = vrot.lane.b32.xlu1 %v589_v40, %s1241_s20 }
  0xed   : > { %582 = vrot.lane.b32.xlu0 %v581_v41, %s1242_s21 }
  0xf2   : > { %v1140_v42 = vpop.f32.mrf.mxu0  ;;  %v1150_v43 = vpop.f32.mrf.mxu1 }
  0xf3   : > { %v578_v44 = vmax.f32 %v1140_v42, %v1150_v43 }
  0xf4   : > { %v481_v45 = vpop.f32.mrf.mxu0  ;;  %v566_v46 = vpop.f32.mrf.mxu1 }
  0xf5   : > { %v605_v47 = vrot.slane %v578_v44, 4  ;;  %v577_v48 = vmax.f32 %v481_v45, %v566_v46 }
  0xf7   : > { %601 = vrot.lane.b32.xlu1 %v577_v48, %s1243_s22  ;;  %606 = vrot.lane.b32.xlu0 %v605_v47, %s1244_s23  ;;  %v597_v49 = vrot.slane %v577_v48, 4 }
  0xfb   : > { %609 = vrot.lane.b32.xlu1 %v578_v44, %s1245_s24  ;;  %598 = vrot.lane.b32.xlu0 %v597_v49, %s1246_s25 }
  0xff   : > { %612 = vrot.lane.b32.xlu0 %v605_v47, %s1247_s26 }
 0x159   : > { %v594_v51 = vpop.permute.xlu1 %593 }
 0x15b   : > { %v586_v50 = vpop.permute.xlu0 %585 }
 0x15d   : > { %v591_v53 = vpop.permute.xlu1 %590 }
 0x15f   : > { %v583_v52 = vpop.permute.xlu0 %582 }
 0x160   : > { %v616_v54 = vsel %vm615_vm14, %v575_v39, %v583_v52 }
 0x161   : > { %v618_v55 = vsel %vm617_vm15, %v616_v54, %v586_v50 }
 0x162   : > { %v620_v58 = vsel %vm619_vm0, %v618_v55, %v591_v53 }
 0x163   : > { %v622_v60 = vsel %vm621_vm1, %v620_v58, %v594_v51 }
 0x169   : > { %v607_v56 = vpop.permute.xlu0 %606  ;;  %v602_v57 = vpop.permute.xlu1 %601 }
 0x16d   : > { %v599_v61 = vpop.permute.xlu0 %598  ;;  %v610_v0 = vpop.permute.xlu1 %609 }
 0x16e   : > { %v624_v62 = vsel %vm623_vm2, %v622_v60, %v599_v61 }
 0x16f   : > { %v626_v63 = vsel %vm625_vm3, %v624_v62, %v602_v57 }
 0x170   : > { %v628_v1 = vsel %vm627_vm4, %v626_v63, %v607_v56 }
 0x171   : > { %v630_v2 = vsel %vm629_vm5, %v628_v1, %v610_v0  ;;  %v613_v3 = vpop.permute.xlu0 %612 }
 0x172   : > { %v632_v4 = vsel %vm631_vm6, %v630_v2, %v613_v3 }
 0x173   : > { %v634_v5 = vsel %vm633_vm7, %v632_v4, 0.0 }
 0x174   : > { %v636_v6 = vrot.slane %v634_v5, 4  ;;  %656 = vrot.lane.b32.xlu1 %v634_v5, %s1249_s27 }
 0x176   : > { %653 = vrot.lane.b32.xlu0 %v636_v6, %s1250_s28 }
 0x178   : > { %659 = vrot.lane.b32.xlu1 %v636_v6, %s1252_s29 }
 0x17a   : > { %647 = vrot.lane.b32.xlu0 %v636_v6, %s1253_s30 }
 0x17c   : > { %650 = vrot.lane.b32.xlu1 %v634_v5, %s1550_s4  ;;  %s1273_s4 = smov 69  }
 0x17e   : > { %641 = vrot.lane.b32.xlu0 %v636_v6, %s1255_s5 }
 0x180   : > { %644 = vrot.lane.b32.xlu1 %v634_v5, %s1547_s6  ;;  %s1267_s6 = smov 89  }
 0x182   : > { %638 = vrot.lane.b32.xlu0 %v634_v5, %s1549_s7 }
 0x1e6   : > { %v657_v7 = vpop.permute.xlu1 %656 }
 0x1e8   : > { %v654_v8 = vpop.permute.xlu0 %653 }
 0x1e9   : > { %v664_v10 = vsel %vm387_vm8, %v654_v8, %v657_v7 }
 0x1ea   : > { %v660_v9 = vpop.permute.xlu1 %659 }
 0x1eb   : > { %1152 = vmatpush3.msk.msra.mxu0 %vm387_vm8, %v660_v9 }
 0x1ec   : > { %v648_v11 = vpop.permute.xlu0 %647  ;;  %1153 = vmatprep.subr.mxu0 %v1248_v59 }
 0x1ed   : > { %1154 = vmatpush3.msra.mxu0 %v664_v10 }
 0x1ee   : > { %v651_v12 = vpop.permute.xlu1 %650  ;;  %1155 = vmatprep.subr.mxu0 %v1248_v59 }
 0x1ef   : > { %v663_v13 = vsel %vm387_vm8, %v648_v11, %v651_v12 }
 0x1f0   : > { %v642_v14 = vpop.permute.xlu0 %641  ;;  %1156 = vmatpush3.msra.mxu0 %v663_v13 }
 0x1f1   : > { %1157 = vmatprep.subr.mxu0 %v1248_v59 }
 0x1f2   : > { %v645_v15 = vpop.permute.xlu1 %644 }
 0x1f3   : > { %v662_v16 = vsel %vm387_vm8, %v642_v14, %v645_v15 }
 0x1f4   : > { %v639_v17 = vpop.permute.xlu0 %638  ;;  %1158 = vmatpush3.msra.mxu0 %v662_v16 }
 0x1f5   : > { %v661_v19 = vsel %vm387_vm8, %v636_v6, %v639_v17  ;;  %1159 = vmatprep.subr.mxu0 %v1248_v59 }
 0x1f6   : > { %1160 = vmatpush3.msra.mxu0 %v661_v19 }
 0x1f7   : > { %1162 = vmatmul.mubr.msk.f32.vlgmr.msra.gmra.mxu0 %vm665_vm11, %v579_v18 }
 0x2b7   : > { %v737_v20 = vpop.f32.mrf.mxu0 }
 0x2b8   : > { %v741_v21 = vmul.f32 0.01, %v737_v20 }
 0x2b9   : > { %v1163_v22 = vpop.f32.mrf.mxu0 }
 0x2ba   : > { %v742_v23 = vmax.f32 %v737_v20, %v741_v21 }
 0x2bc   : > { %747 = vrot.lane.b32.xlu0 %v742_v23, %s1258_s10  ;;  %744 = vrot.lane.b32.xlu1 %v742_v23, %s1549_s7  ;;  %s1266_s10 = smov 99   ;;  %s1268_s7 = smov 87  }
 0x2c0   : > { %757 = vrot.lane.b32.xlu0 %v742_v23, %s1253_s30  ;;  %750 = vrot.lane.b32.xlu1 %v742_v23, %s1259_s11  ;;  %s1269_s11 = smov 77  }
 0x2c4   : > { %763 = vrot.lane.b32.xlu0 %v742_v23, %s1260_s14  ;;  %760 = vrot.lane.b32.xlu1 %v742_v23, %s1261_s15  ;;  %s1270_s14 = smov 91   ;;  %s1271_s15 = smov 81  }
 0x2c8   : > { %771 = vrot.lane.b32.xlu0 %v742_v23, %s1262_s16  ;;  %768 = vrot.lane.b32.xlu1 %v742_v23, %s1249_s27  ;;  %s1272_s16 = smov 79  }
 0x2cc   : > { %779 = vrot.lane.b32.xlu0 %v742_v23, %s1263_s17  ;;  %774 = vrot.lane.b32.xlu1 %v742_v23, %s1264_s8  ;;  %s1274_s17 = smov 67   ;;  %s1275_s8 = smov 57  }
 0x2d0   : > { %785 = vrot.lane.b32.xlu0 %v742_v23, %s1265_s9  ;;  %782 = vrot.lane.b32.xlu1 %v742_v23, %s1266_s10  ;;  %s1276_s9 = smov 71   ;;  %s1277_s10 = smov 61  }
 0x2d4   : > { %793 = vrot.lane.b32.xlu0 %v742_v23, %s1267_s6  ;;  %790 = vrot.lane.b32.xlu1 %v742_v23, %s1268_s7  ;;  %s1278_s6 = smov 59  }
 0x2d8   : > { %801 = vrot.lane.b32.xlu0 %v742_v23, %s1269_s11  ;;  %796 = vrot.lane.b32.xlu1 %v742_v23, %s1270_s14 }
 0x2dc   : > { %807 = vrot.lane.b32.xlu0 %v742_v23, %s1271_s15  ;;  %804 = vrot.lane.b32.xlu1 %v742_v23, %s1272_s16 }
 0x2e0   : > { %815 = vrot.lane.b32.xlu0 %v742_v23, %s1273_s4  ;;  %812 = vrot.lane.b32.xlu1 %v742_v23, %s1274_s17 }
 0x2e4   : > { %823 = vrot.lane.b32.xlu0 %v742_v23, %s1275_s8  ;;  %818 = vrot.lane.b32.xlu1 %v742_v23, %s1276_s9 }
 0x2e8   : > { %829 = vrot.lane.b32.xlu0 %v742_v23, %s1277_s10  ;;  %826 = vrot.lane.b32.xlu1 %v742_v23, %s1278_s6 }
 0x32e   : > { %v748_v24 = vpop.permute.xlu0 %747  ;;  %v745_v25 = vpop.permute.xlu1 %744 }
 0x32f   : > { %v754_v26 = vsel %vm753_vm12, %v745_v25, %v748_v24 }
 0x332   : > { %v758_v27 = vpop.permute.xlu0 %757  ;;  %v751_v28 = vpop.permute.xlu1 %750 }
 0x333   : > { %v756_v29 = vsel %vm755_vm13, %v754_v26, %v751_v28 }
 0x334   : > { %836 = vrot.lane.b32.xlu1 %v756_v29, %s1242_s21 }
 0x336   : > { %v764_v30 = vpop.permute.xlu0 %763  ;;  %v761_v31 = vpop.permute.xlu1 %760 }
 0x337   : > { %v766_v32 = vsel %vm753_vm12, %v758_v27, %v761_v31 }
 0x338   : > { %v767_v33 = vsel %vm755_vm13, %v766_v32, %v764_v30  ;;  %v834_v32 = vld [vmem:[%s1545_s2] sm:$0xff] }
 0x339   : > { %840 = vrot.lane.b32.xlu0 %v767_v33, %s1240_s19  ;;  %s1553_s19 = smov 127  }
 0x33a   : > { %v772_v34 = vpop.permute.xlu0 %771  ;;  %v769_v35 = vpop.permute.xlu1 %768 }
 0x33b   : > { %v777_v36 = vsel %vm753_vm12, %v769_v35, %v772_v34 }
 0x33e   : > { %v780_v37 = vpop.permute.xlu0 %779  ;;  %v775_v38 = vpop.permute.xlu1 %774 }
 0x33f   : > { %v778_v39 = vsel %vm755_vm13, %v777_v36, %v775_v38 }
 0x340   : > { %844 = vrot.lane.b32.xlu1 %v778_v39, %s1241_s20  ;;  %s1554_s20 = smov 118  }
 0x342   : > { %v786_v40 = vpop.permute.xlu0 %785  ;;  %v783_v41 = vpop.permute.xlu1 %782 }
 0x343   : > { %v788_v42 = vsel %vm753_vm12, %v780_v37, %v783_v41 }
 0x344   : > { %v789_v43 = vsel %vm755_vm13, %v788_v42, %v786_v40 }
 0x345   : > { %848 = vrot.lane.b32.xlu0 %v789_v43, %s1239_s18  ;;  %s1552_s18 = smov 116  }
 0x346   : > { %v794_v44 = vpop.permute.xlu0 %793  ;;  %v791_v45 = vpop.permute.xlu1 %790 }
 0x347   : > { %v799_v46 = vsel %vm753_vm12, %v791_v45, %v794_v44 }
 0x34a   : > { %v802_v47 = vpop.permute.xlu0 %801  ;;  %v797_v48 = vpop.permute.xlu1 %796 }
 0x34b   : > { %v800_v49 = vsel %vm755_vm13, %v799_v46, %v797_v48 }
 0x34c   : > { %852 = vrot.lane.b32.xlu1 %v800_v49, %s1246_s25  ;;  %s1281_s25 = smov 122  }
 0x34e   : > { %v808_v50 = vpop.permute.xlu0 %807  ;;  %v805_v51 = vpop.permute.xlu1 %804 }
 0x34f   : > { %v810_v52 = vsel %vm753_vm12, %v802_v47, %v805_v51 }
 0x350   : > { %v811_v53 = vsel %vm755_vm13, %v810_v52, %v808_v50 }
 0x351   : > { %856 = vrot.lane.b32.xlu0 %v811_v53, %s1243_s22 }
 0x352   : > { %v816_v54 = vpop.permute.xlu0 %815  ;;  %v813_v55 = vpop.permute.xlu1 %812 }
 0x353   : > { %v821_v56 = vsel %vm753_vm12, %v813_v55, %v816_v54 }
 0x356   : > { %v824_v57 = vpop.permute.xlu0 %823  ;;  %v819_v58 = vpop.permute.xlu1 %818 }
 0x357   : > { %v822_v60 = vsel %vm755_vm13, %v821_v56, %v819_v58 }
 0x358   : > { %860 = vrot.lane.b32.xlu1 %v822_v60, %s1244_s23  ;;  %s1279_s23 = smov 124  }
 0x35a   : > { %v830_v61 = vpop.permute.xlu0 %829  ;;  %v827_v62 = vpop.permute.xlu1 %826 }
 0x35b   : > { %v832_v63 = vsel %vm753_vm12, %v824_v57, %v827_v62 }
 0x35c   : > { %867 = vrot.lane.b32.xlu1 %v822_v60, %s1247_s26  ;;  %v833_v0 = vsel %vm755_vm13, %v832_v63, %v830_v61  ;;  %s1282_s26 = smov 114  }
 0x35d   : > { %864 = vrot.lane.b32.xlu0 %v833_v0, %s1245_s24  ;;  %s1280_s24 = smov 120  }
 0x3a6   : > { %v837_v1 = vpop.permute.xlu1 %836 }
 0x3a7   : > { %v870_v6 = vsel %vm615_vm14, %v767_v33, %v837_v1  ;;  %vm1011_vm14 = vcmask 195584  }
 0x3ab   : > { %v841_v3 = vpop.permute.xlu0 %840 }
 0x3ac   : > { %v871_v7 = vsel %vm617_vm15, %v870_v6, %v841_v3  ;;  %vm1013_vm15 = vcmask 261120  }
 0x3b2   : > { %v845_v2 = vpop.permute.xlu1 %844 }
 0x3b3   : > { %v872_v9 = vsel %vm619_vm0, %v871_v7, %v845_v2  ;;  %vm1016_vm0 = vcmask 392192  }
 0x3b7   : > { %v849_v5 = vpop.permute.xlu0 %848 }
 0x3b8   : > { %v873_v11 = vsel %vm621_vm1, %v872_v9, %v849_v5 }
 0x3be   : > { %v853_v4 = vpop.permute.xlu1 %852 }
 0x3bf   : > { %v874_v12 = vsel %vm623_vm2, %v873_v11, %v853_v4  ;;  %vm1018_vm2 = vcmask 457728  }
 0x3c3   : > { %v857_v10 = vpop.permute.xlu0 %856 }
 0x3c4   : > { %v875_v13 = vsel %vm625_vm3, %v874_v12, %v857_v10  ;;  %vm1020_vm3 = vcmask 523264  }
 0x3ca   : > { %v861_v8 = vpop.permute.xlu1 %860 }
 0x3cb   : > { %v876_v14 = vsel %vm627_vm4, %v875_v13, %v861_v8 }
 0x3ce   : > { %v868_v16 = vpop.permute.xlu1 %867 }
 0x3cf   : > { %v865_v15 = vpop.permute.xlu0 %864 }
 0x3d0   : > { %v877_v17 = vsel %vm629_vm5, %v876_v14, %v865_v15 }
 0x3d1   : > { %v878_v18 = vsel %vm631_vm6, %v877_v17, %v868_v16 }
 0x3d2   : > { %v879_v19 = vsel %vm633_vm7, %v878_v18, 0.0 }
 0x3d3   : > { %897 = vrot.lane.b32.xlu1 %v879_v19, %s1250_s28  ;;  %903 = vrot.lane.b32.xlu0 %v879_v19, %s1252_s29  ;;  %v881_v20 = vrot.slane %v879_v19, 4 }
 0x3d7   : > { %891 = vrot.lane.b32.xlu1 %v879_v19, %s1253_s30  ;;  %900 = vrot.lane.b32.xlu0 %v881_v20, %s1249_s27  ;;  %s1082_s27 = sshll.u32 %s1556_s13, 3 }
 0x3d8   : > { %s168_s30 = scalar_lea.vmem %s1546_s3, %s1082_s27 }
 0x3db   : > { %885 = vrot.lane.b32.xlu1 %v879_v19, %s1255_s5  ;;  %894 = vrot.lane.b32.xlu0 %v881_v20, %s1552_s18 }
 0x3df   : > { %882 = vrot.lane.b32.xlu1 %v881_v20, %s1553_s19  ;;  %888 = vrot.lane.b32.xlu0 %v881_v20, %s1554_s20 }
 0x445   : > { %v898_v21 = vpop.permute.xlu1 %897  ;;  %v904_v22 = vpop.permute.xlu0 %903 }
 0x446   : > { %1165 = vmatpush3.msk.msra.mxu1 %vm387_vm8, %v904_v22 }
 0x447   : > { %1166 = vmatprep.subr.mxu1 %v1248_v59 }
 0x449   : > { %v892_v23 = vpop.permute.xlu1 %891  ;;  %v901_v24 = vpop.permute.xlu0 %900 }
 0x44a   : > { %v908_v25 = vsel %vm387_vm8, %v898_v21, %v901_v24 }
 0x44b   : > { %1167 = vmatpush3.msra.mxu1 %v908_v25 }
 0x44c   : > { %1168 = vmatprep.subr.mxu1 %v1248_v59 }
 0x44d   : > { %v886_v26 = vpop.permute.xlu1 %885  ;;  %v895_v27 = vpop.permute.xlu0 %894 }
 0x44e   : > { %v907_v28 = vsel %vm387_vm8, %v892_v23, %v895_v27 }
 0x44f   : > { %1169 = vmatpush3.msra.mxu1 %v907_v28 }
 0x450   : > { %1170 = vmatprep.subr.mxu1 %v1248_v59 }
 0x451   : > { %v883_v29 = vpop.permute.xlu1 %882  ;;  %v889_v30 = vpop.permute.xlu0 %888 }
 0x452   : > { %v906_v31 = vsel %vm387_vm8, %v886_v26, %v889_v30  ;;  %v905_v33 = vsel %vm387_vm8, %v879_v19, %v883_v29  ;;  %vm1008_vm8 = vcmask 64512  }
 0x453   : > { %1171 = vmatpush3.msra.mxu1 %v906_v31 }
 0x454   : > { %1172 = vmatprep.subr.mxu1 %v1248_v59 }
 0x455   : > { %1173 = vmatpush3.msra.mxu1 %v905_v33 }
 0x456   : > { %1175 = vmatmul.mubr.msk.f32.vlgmr.msra.gmra.mxu1 %vm665_vm11, %v834_v32 }
 0x516   : > { %v980_v34 = vpop.f32.mrf.mxu1 }
 0x517   : > { %v984_v35 = vmul.f32 0.01, %v980_v34 }
 0x518   : > { %v1176_v36 = vpop.f32.mrf.mxu1 }
 0x519   : > { %v985_v37 = vmax.f32 %v980_v34, %v984_v35 }
 0x51b   : > { %990 = vrot.lane.b32.xlu1 %v985_v37, %s1279_s23  ;;  %987 = vrot.lane.b32.xlu0 %v985_v37, %s1255_s5 }
 0x51f   : > { %996 = vrot.lane.b32.xlu1 %v985_v37, %s1280_s24  ;;  %993 = vrot.lane.b32.xlu0 %v985_v37, %s1281_s25 }
 0x523   : > { %1002 = vrot.lane.b32.xlu1 %v985_v37, %s1552_s18  ;;  %999 = vrot.lane.b32.xlu0 %v985_v37, %s1554_s20 }
 0x527   : > { %1005 = vrot.lane.b32.xlu0 %v985_v37, %s1282_s26 }
 0x58d   : > { %v991_v59 = vpop.permute.xlu1 %990  ;;  %v988_v38 = vpop.permute.xlu0 %987 }
 0x58e   : > { %v1009_v39 = vsel %vm1008_vm8, %v985_v37, %v988_v38 }
 0x58f   : > { %v1010_v41 = vsel %vm392_vm9, %v1009_v39, %v991_v59 }
 0x591   : > { %v997_v40 = vpop.permute.xlu1 %996  ;;  %v994_v42 = vpop.permute.xlu0 %993 }
 0x592   : > { %v1012_v43 = vsel %vm1011_vm14, %v1010_v41, %v994_v42 }
 0x593   : > { %v1014_v44 = vsel %vm1013_vm15, %v1012_v43, %v997_v40 }
 0x595   : > { %v1000_v45 = vpop.permute.xlu0 %999  ;;  %v1003_v46 = vpop.permute.xlu1 %1002 }
 0x596   : > { %v1015_v47 = vsel %vm621_vm1, %v1014_v44, %v1000_v45 }
 0x597   : > { %v1017_v48 = vsel %vm1016_vm0, %v1015_v47, %v1003_v46 }
 0x599   : > { %v1006_v49 = vpop.permute.xlu0 %1005 }
 0x59a   : > { %v1019_v50 = vsel %vm1018_vm2, %v1017_v48, %v1006_v49 }
 0x59b   : > { %1021 = vst.msk [vmem:[%s168_s30] sm:$0xff] %vm1020_vm3, %v1019_v50 }
 0x59c PF: > { %s13_s12 = sadd.s32 1, %s1236_s12  }
 0x59d   : > { %p10_p4 = scmp.ge.s32.totalorder %s13_s12, 4  }
 0x59f   :  { %12 = sbr.rel (!%p10_p4) target bundleno = 1 (0x1), region = 62 }

</bundles_post_ra>
